<compile_context>
chip_gen: v5e
topology: v5e:2x2
jax: 0.10.0
libtpu: 0.0.40
codegen_flags: <defaults>
</compile_context>

<pallas_src>
import math

import jax
import jax.numpy as jnp
from jax.experimental import pallas as pl
from jax.experimental.pallas import tpu as pltpu


def _round_up(x, m):
    return ((x + m - 1) // m) * m


def _pick_tm(kp, ocp):
    """Largest M-tile whose (double-buffered) working set stays ~<24 MiB (v7x-safe)."""
    for tm in (512, 256, 128):
        need = (2 * tm * kp * 2      # bf16 patches tile, double buffered
                + 2 * kp * ocp * 2   # bf16 weight block
                + 2 * tm * ocp * 4   # f32 y tile
                + 2 * 8 * ocp * 4)   # stats block
        if need < (24 << 20):
            return tm
    return 128


def _vmem_limit(tm, kp, ocp):
    need = (2 * tm * kp * 2 + 2 * kp * ocp * 2 + 2 * tm * ocp * 4
            + 2 * 8 * ocp * 4 + (2 << 20))
    return int(min(max(2 * need, 16 << 20), 48 << 20))


# ---------------------------------------------------------------------------
# Pass 1: conv-as-matmul (bf16 in, f32 acc) + per-tile partial BN statistics.
# ---------------------------------------------------------------------------
def conv_stats_kernel(p_ref, w_ref, y_ref, stats_ref):
    # p_ref: (tm, Kp) bf16 | w_ref: (Kp, OCp) bf16
    # y_ref: (tm, OCp) f32 | stats_ref: (8, OCp) f32 (rows 0=sum, 1=sum of squares)
    y = jnp.dot(p_ref[...], w_ref[...], preferred_element_type=jnp.float32)
    y_ref[...] = y

    col_sum = jnp.sum(y, axis=0, keepdims=True)       # (1, OCp)
    col_sq = jnp.sum(y * y, axis=0, keepdims=True)    # (1, OCp)

    # Pack [sum, sumsq, 0...] into a full (8, OCp) block -> one unmasked store.
    row_ids = jax.lax.broadcasted_iota(jnp.int32, (8, col_sum.shape[1]), 0)
    stats = jnp.where(row_ids == 0, col_sum,
                      jnp.where(row_ids == 1, col_sq, jnp.float32(0.0)))
    stats_ref[...] = stats


# ---------------------------------------------------------------------------
# Pass 2: apply the folded BN affine:  out = y * scale + shift
# ---------------------------------------------------------------------------
def bn_apply_kernel(y_ref, scale_ref, shift_ref, out_ref):
    out_ref[...] = (y_ref[...] * scale_ref[...] + shift_ref[...]).astype(out_ref.dtype)


def my_conv2d_forward(x, weight, bias, gamma, beta, *, eps=1e-5, tm=None):
    """x: (N, C, H, W) f32; weight: (OC, C, KH, KW); bias/gamma/beta: (OC,).

    Returns NCHW (N, OC, OH, OW) with OH = H - KH + 1, OW = W - KW + 1
    (stride=1, padding=0, dilation=1, groups=1, as in MyConv2d's conv).
    """
    N, C, H, W = x.shape
    OC, _, KH, KW = weight.shape
    OH, OW = H - KH + 1, W - KW + 1
    M, K = N * OH * OW, C * KH * KW

    OCp = _round_up(OC, 128)
    Kp = _round_up(K, 128)
    if tm is None:
        tm = _pick_tm(Kp, OCp)
    grid_m = pl.cdiv(M, tm)
    M_pad = grid_m * tm
    vmem_bytes = _vmem_limit(tm, Kp, OCp)

    # --- im2col in NHWC; K-axis ordered (kh, kw, c) ---------------------------
    # TODO(synk): build patches inside the kernel from an NHWC x tile with
    # shifted pl.ds reads so the 9x-amplified im2col array never hits HBM.
    x_nhwc = jnp.transpose(x, (0, 2, 3, 1))                       # (N, H, W, C)
    cols = jnp.stack(
        [x_nhwc[:, i:i + OH, j:j + OW, :] for i in range(KH) for j in range(KW)],
        axis=3,
    )                                                             # (N, OH, OW, KH*KW, C)
    patches = cols.reshape(M, K)

    # Zero padding: extra K columns / M rows contribute 0 to the matmul and to
    # the BN sums; extra OC columns have gamma=0 so they normalize to 0.
    patches_p = jnp.pad(patches, ((0, M_pad - M), (0, Kp - K))).astype(jnp.bfloat16)
    w2d = jnp.transpose(weight, (2, 3, 1, 0)).reshape(K, OC)      # (kh,kw,c) x oc
    w_p = jnp.pad(w2d, ((0, Kp - K), (0, OCp - OC))).astype(jnp.bfloat16)

    # Conv bias is intentionally NOT applied: BN's batch-mean subtraction
    # cancels a per-channel constant exactly, and the variance is unchanged.
    del bias

    y_flat, stats_partial = pl.pallas_call(
        conv_stats_kernel,
        out_shape=(
            jax.ShapeDtypeStruct((M_pad, OCp), jnp.float32),
            jax.ShapeDtypeStruct((grid_m, 8, OCp), jnp.float32),
        ),
        grid=(grid_m,),
        in_specs=[
            pl.BlockSpec((tm, Kp), lambda i: (i, 0)),
            pl.BlockSpec((Kp, OCp), lambda i: (0, 0)),
        ],
        out_specs=(
            pl.BlockSpec((tm, OCp), lambda i: (i, 0)),
            pl.BlockSpec((None, 8, OCp), lambda i: (i, 0, 0)),
        ),
        compiler_params=pltpu.CompilerParams(
            dimension_semantics=("parallel",), vmem_limit_bytes=vmem_bytes),
        cost_estimate=pl.CostEstimate(
            flops=2 * M_pad * Kp * OCp,
            transcendentals=0,
            bytes_accessed=(M_pad * Kp * 2 + Kp * OCp * 2
                            + M_pad * OCp * 4 + grid_m * 8 * OCp * 4)),
    )(patches_p, w_p)

    # --- combine per-tile partial stats (tiny) and fold BN into scale/shift ---
    stats = jnp.sum(stats_partial, axis=0)                # (8, OCp)
    col_sum, col_sq = stats[0:1, :], stats[1:2, :]        # (1, OCp)
    inv_m = jnp.float32(1.0 / M)                          # real (unpadded) row count
    mean = col_sum * inv_m
    var = col_sq * inv_m - mean * mean                    # biased batch variance
    inv_std = jax.lax.rsqrt(var + jnp.float32(eps))
    g_p = jnp.pad(gamma.reshape(1, OC).astype(jnp.float32), ((0, 0), (0, OCp - OC)))
    b_p = jnp.pad(beta.reshape(1, OC).astype(jnp.float32), ((0, 0), (0, OCp - OC)))
    scale = g_p * inv_std                                 # (1, OCp)
    shift = b_p - mean * scale                            # (1, OCp)

    out_flat = pl.pallas_call(
        bn_apply_kernel,
        out_shape=jax.ShapeDtypeStruct((M_pad, OCp), jnp.float32),
        grid=(grid_m,),
        in_specs=[
            pl.BlockSpec((tm, OCp), lambda i: (i, 0)),
            pl.BlockSpec((1, OCp), lambda i: (0, 0)),
            pl.BlockSpec((1, OCp), lambda i: (0, 0)),
        ],
        out_specs=pl.BlockSpec((tm, OCp), lambda i: (i, 0)),
        compiler_params=pltpu.CompilerParams(
            dimension_semantics=("parallel",), vmem_limit_bytes=vmem_bytes),
        cost_estimate=pl.CostEstimate(
            flops=2 * M_pad * OCp,
            transcendentals=0,
            bytes_accessed=2 * M_pad * OCp * 4 + 2 * OCp * 4),
    )(y_flat, scale, shift)

    # Slice off padding; back to NCHW.  (The transpose is pure layout overhead
    # and could be dropped if the consumer accepts NHWC.)
    out_nhwc = out_flat[:M, :OC].reshape(N, OH, OW, OC)
    return jnp.transpose(out_nhwc, (0, 3, 1, 2))


def _reference_forward(x, weight, bias, gamma, beta, eps=1e-5):
    """Pure-JAX f32 reference: conv + training-mode BatchNorm2d."""
    y = jax.lax.conv_general_dilated(
        x, weight, window_strides=(1, 1), padding="VALID",
        dimension_numbers=("NCHW", "OIHW", "NCHW"))
    y = y + bias.reshape(1, -1, 1, 1)
    mean = jnp.mean(y, axis=(0, 2, 3), keepdims=True)
    var = jnp.mean((y - mean) ** 2, axis=(0, 2, 3), keepdims=True)
    xhat = (y - mean) * jax.lax.rsqrt(var + eps)
    return xhat * gamma.reshape(1, -1, 1, 1) + beta.reshape(1, -1, 1, 1)


if __name__ == "__main__":
    # Small config consistent with MyConv2d(n_channels, out_channels, kernel_size).
    N, C, H, W = 2, 4, 16, 16
    OC, KH, KW = 8, 3, 3

    key = jax.random.PRNGKey(0)
    kx, kw_, kb = jax.random.split(key, 3)

    x = jax.random.normal(kx, (N, C, H, W), dtype=jnp.float32)

    # Deterministic parameter init (PyTorch Conv2d-style uniform bound).
    fan_in = C * KH * KW
    bound = 1.0 / math.sqrt(fan_in)
    weight = jax.random.uniform(kw_, (OC, C, KH, KW), jnp.float32, -bound, bound)
    bias = jax.random.uniform(kb, (OC,), jnp.float32, -bound, bound)

    # BatchNorm2d default init: weight=1, bias=0.
    gamma = jnp.ones((OC,), jnp.float32)
    beta = jnp.zeros((OC,), jnp.float32)

    out = my_conv2d_forward(x, weight, bias, gamma, beta)
    jax.block_until_ready(out)
    assert out.shape == (N, OC, H - KH + 1, W - KW + 1)

    # Correctness check vs. pure-JAX f32 reference (loose tol: bf16 matmul operands).
    ref = _reference_forward(x, weight, bias, gamma, beta)
    err = float(jnp.max(jnp.abs(out - ref)))
    assert err < 5e-2, f"max abs err {err}"

    print("KERNEL_OK")
</pallas_src>

<mosaic_0001>
module attributes {stable_mosaic.version = 11 : i64} {
  func.func @conv_stats_kernel(%arg0: i32, %arg1: memref<512x128xbf16, #tpu.memory_space<vmem>>, %arg2: memref<128x128xbf16, #tpu.memory_space<vmem>>, %arg3: memref<512x128xf32, #tpu.memory_space<vmem>>, %arg4: memref<1x8x128xf32, #tpu.memory_space<vmem>>) attributes {dimension_semantics = [#tpu.dimension_semantics<parallel>], iteration_bounds = array<i64: 1>, scalar_prefetch = 0 : i64, scratch_operands = 0 : i64, tpu.core_type = #tpu.core_type<tc>, window_params = [{transform_indices = @transform_0, window_bounds = array<i64: 512, 128>}, {pipeline_mode = #tpu.pipeline_mode<synchronous>, transform_indices = @transform_1, window_bounds = array<i64: 128, 128>}, {transform_indices = @transform_2, window_bounds = array<i64: 512, 128>}, {transform_indices = @transform_3, window_bounds = array<i64: 1, 8, 128>}]} {
    %c0 = arith.constant 0 : index
    %c0_0 = arith.constant 0 : index
    %0 = vector.load %arg1[%c0, %c0_0] : memref<512x128xbf16, #tpu.memory_space<vmem>>, vector<512x128xbf16>
    %c0_1 = arith.constant 0 : index
    %c0_2 = arith.constant 0 : index
    %1 = vector.load %arg2[%c0_1, %c0_2] : memref<128x128xbf16, #tpu.memory_space<vmem>>, vector<128x128xbf16>
    %cst = arith.constant dense<0.000000e+00> : vector<512x128xf32>
    %2 = tpu.matmul %0, %1, %cst {dimension_numbers = #tpu.dot_dimension_numbers<[1], [0], [0], [1], [0, 0, 1, 1], [], []>} : vector<512x128xbf16>, vector<128x128xbf16>, vector<512x128xf32> -> vector<512x128xf32>
    %c0_3 = arith.constant 0 : index
    %c0_4 = arith.constant 0 : index
    %3 = vector.load %arg3[%c0_3, %c0_4] : memref<512x128xf32, #tpu.memory_space<vmem>>, vector<512x128xf32>
    tpu.vector_store %arg3[%c0_3, %c0_4], %2 {strides = array<i32>} : memref<512x128xf32, #tpu.memory_space<vmem>>, vector<512x128xf32>,
    %cst_5 = arith.constant dense<0.000000e+00> : vector<128xf32>
    %4 = vector.multi_reduction <add>, %2, %cst_5 [0] : vector<512x128xf32> to vector<128xf32>
    %5 = vector.shape_cast %4 : vector<128xf32> to vector<1x128xf32>
    %6 = arith.mulf %2, %2 : vector<512x128xf32>
    %cst_6 = arith.constant dense<0.000000e+00> : vector<128xf32>
    %7 = vector.multi_reduction <add>, %6, %cst_6 [0] : vector<512x128xf32> to vector<128xf32>
    %8 = vector.shape_cast %7 : vector<128xf32> to vector<1x128xf32>
    %9 = tpu.iota {dimensions = array<i32: 0>} : vector<8x128xi32>
    %c0_i32 = arith.constant 0 : i32
    %10 = vector.broadcast %c0_i32 : i32 to vector<8x128xi32>
    %11 = arith.cmpi eq, %9, %10 : vector<8x128xi32>
    %c1_i32 = arith.constant 1 : i32
    %12 = vector.broadcast %c1_i32 : i32 to vector<8x128xi32>
    %13 = arith.cmpi eq, %9, %12 : vector<8x128xi32>
    %cst_7 = arith.constant 0.000000e+00 : f32
    %14 = vector.shape_cast %8 : vector<1x128xf32> to vector<1x128xf32>
    %15 = vector.broadcast %14 : vector<1x128xf32> to vector<8x128xf32>
    %16 = vector.broadcast %cst_7 : f32 to vector<8x128xf32>
    %17 = arith.select %13, %15, %16 : vector<8x128xi1>, vector<8x128xf32>
    %18 = vector.shape_cast %5 : vector<1x128xf32> to vector<1x128xf32>
    %19 = vector.broadcast %18 : vector<1x128xf32> to vector<8x128xf32>
    %20 = arith.select %11, %19, %17 : vector<8x128xi1>, vector<8x128xf32>
    %c0_8 = arith.constant 0 : index
    %c0_9 = arith.constant 0 : index
    %c0_10 = arith.constant 0 : index
    %21 = vector.load %arg4[%c0_8, %c0_9, %c0_10] : memref<1x8x128xf32, #tpu.memory_space<vmem>>, vector<1x8x128xf32>
    %22 = vector.shape_cast %21 : vector<1x8x128xf32> to vector<8x128xf32>
    %23 = vector.shape_cast %20 : vector<8x128xf32> to vector<1x8x128xf32>
    tpu.vector_store %arg4[%c0_8, %c0_9, %c0_10], %23 {strides = array<i32>} : memref<1x8x128xf32, #tpu.memory_space<vmem>>, vector<1x8x128xf32>,
    return
  }
  func.func @transform_0(%arg0: i32) -> (i32, i32) {
    %c0_i32 = arith.constant 0 : i32
    %c0_i32_0 = arith.constant 0 : i32
    return %arg0, %c0_i32 : i32, i32
  }
  func.func @transform_1(%arg0: i32) -> (i32, i32) {
    %c0_i32 = arith.constant 0 : i32
    %c0_i32_0 = arith.constant 0 : i32
    %c0_i32_1 = arith.constant 0 : i32
    return %c0_i32, %c0_i32_0 : i32, i32
  }
  func.func @transform_2(%arg0: i32) -> (i32, i32) {
    %c0_i32 = arith.constant 0 : i32
    %c0_i32_0 = arith.constant 0 : i32
    return %arg0, %c0_i32 : i32, i32
  }
  func.func @transform_3(%arg0: i32) -> (i32, i32, i32) {
    %c0_i32 = arith.constant 0 : i32
    %c0_i32_0 = arith.constant 0 : i32
    %c0_i32_1 = arith.constant 0 : i32
    return %arg0, %c0_i32, %c0_i32_0 : i32, i32, i32
  }
}

</mosaic_0001>

<bundles_post_ra>
// kernel: tpu_custom_call.1
= control target key start
LH: loop header
LB: loop body
LE: loop exit
PB: predicated region body
PF: predicated region fallthrough
CT: control target
= control target key end

     0   :  { %9 = vsyncpa [#allocation3], 0  ;;  %s1515_s0 = inlined_call_operand.hbm [shape: bf16[512,128], index: 0, kind: input, shape index: {}]   ;;  %s1516_s1 = inlined_call_operand.hbm [shape: bf16[128,128], index: 1, kind: input, shape index: {}]   ;;  %s1517_s2 = inlined_call_operand.hbm [shape: f32[512,128], index: 2, kind: output, shape index: {0}]   ;;  %s1518_s3 = inlined_call_operand.hbm [shape: f32[1,8,128], index: 3, kind: output, shape index: {1}]  }
   0x1   :  { %10 = vsyncpa [#allocation6], 0 }
   0x2   :  { %11 = vsyncpa [#allocation4], 0 }
   0x3   :  { %12 = vsyncpa [#allocation9], 0  ;;  %s17_s14 = sshll.u32 %s1515_s0, 4  ;;  %s1181_s15 = smov [#allocation2]   ;;  %s18_s14 = int_to_ptr.hbm [resolvable:$true] %s17_s14 }
   0x4   :  { %s19_s16 = sshll.u32 %s1181_s15, 4  ;;  %s30_s19 = sshll.u32 %s1516_s1, 4  ;;  %s20_s16 = int_to_ptr.vmem [resolvable:$true] %s19_s16  ;;  %s31_s19 = int_to_ptr.hbm [resolvable:$true] %s30_s19 }
   0x5   :  { %s1182_s20 = smov 64   ;;  %s1183_s21 = smov 4  }
   0x6   :  { %25 = dma.hbm_to_vmem [thread:$0]  %s18_s14, 4096, %s20_s16, [#allocation3], %s1182_s20, %s1182_s20, %s1183_s21  }
   0x7   :  { %s1184_s22 = smov [#allocation5]  }
   0x8   :  { %s32_s23 = sshll.u32 %s1184_s22, 4  ;;  %s33_s23 = int_to_ptr.vmem [resolvable:$true] %s32_s23 }
   0x9   :  { %38 = dma.hbm_to_vmem [thread:$0]  %s31_s19, 1024, %s33_s23, [#allocation6], %s1182_s20, %s1182_s20, %s1183_s21  }
   0xa   :  { %1173 = dma.done.wait [#allocation3], 4096  }
   0xb   :  { %1174 = vsyncadd [#allocation3], 4294963200 }
   0xc   :  { %1175 = dma.done.wait [#allocation6], 1024  }
   0xd   :  { %1176 = vsyncadd [#allocation6], 4294966272  ;;  %v1044_v0 = vld [vmem:[#allocation5 + $0x38] sm:$0xff]  ;;  %v1043_v1 = vld [vmem:[#allocation5 + $0x30] sm:$0xff]  ;;  %s1185_s0 = smov [#allocation7]   ;;  %s815_s26 = sshll.u32 %s1517_s2, 4  ;;  %s816_s26 = int_to_ptr.hbm [resolvable:$true] %s815_s26 }
   0xe   :  { %367 = vmatpush.bf16.msra.mxu0 %v1044_v0  ;;  %1045 = vmatpush.bf16.msra.mxu1 %v1044_v0  ;;  %v1042_v2 = vld [vmem:[#allocation5 + $0x28] sm:$0xff]  ;;  %v1041_v3 = vld [vmem:[#allocation5 + $0x20] sm:$0xff]  ;;  %v1040_v4 = vld [vmem:[#allocation5 + $0x18] sm:$0xff]  ;;  %s813_s1 = sshll.u32 %s1185_s0, 4  ;;  %s1186_s2 = smov 128   ;;  %s814_s1 = int_to_ptr.vmem [resolvable:$true] %s813_s1 }
   0xf   :  { %1046 = vmatpush.bf16.msra.mxu2 %v1044_v0  ;;  %1047 = vmatpush.bf16.msra.mxu3 %v1044_v0  ;;  %v1039_v5 = vld [vmem:[#allocation5 + $0x10] sm:$0xff]  ;;  %v1038_v6 = vld [vmem:[#allocation5 + $0x8] sm:$0xff]  ;;  %v1037_v7 = vld [vmem:[#allocation5] sm:$0xff]  ;;  %s1187_s27 = smov 8   ;;  %s1188_s28 = smov [#allocation8]  }
  0x10   :  { %v1005_v8 = vld [vmem:[#allocation2] sm:$0xff]  ;;  %v1006_v10 = vld [vmem:[#allocation2 + $0x8] sm:$0xff]  ;;  %v1007_v13 = vld [vmem:[#allocation2 + $0x10] sm:$0xff]  ;;  %s827_s29 = sshll.u32 %s1188_s28, 4  ;;  %s829_s5 = sshll.u32 %s1518_s3, 4  ;;  %s828_s29 = int_to_ptr.vmem [resolvable:$true] %s827_s29  ;;  %s830_s5 = int_to_ptr.hbm [resolvable:$true] %s829_s5 }
  0x11   :  { %v1013_v9 = vld [vmem:[#allocation2 + $0x40] sm:$0xff]  ;;  %v1014_v11 = vld [vmem:[#allocation2 + $0x48] sm:$0xff]  ;;  %v1015_v14 = vld [vmem:[#allocation2 + $0x50] sm:$0xff] }
  0x12   :  { %368 = vmatpush.bf16.msra.mxu0 %v1043_v1  ;;  %1048 = vmatpush.bf16.msra.mxu1 %v1043_v1  ;;  %v1021_v12 = vld [vmem:[#allocation2 + $0x80] sm:$0xff]  ;;  %v1022_v15 = vld [vmem:[#allocation2 + $0x88] sm:$0xff]  ;;  %v1008_v16 = vld [vmem:[#allocation2 + $0x18] sm:$0xff] }
  0x13   :  { %1049 = vmatpush.bf16.msra.mxu2 %v1043_v1  ;;  %1050 = vmatpush.bf16.msra.mxu3 %v1043_v1  ;;  %v1016_v17 = vld [vmem:[#allocation2 + $0x58] sm:$0xff]  ;;  %v1023_v18 = vld [vmem:[#allocation2 + $0x90] sm:$0xff]  ;;  %v1029_v19 = vld [vmem:[#allocation2 + $0xc0] sm:$0xff] }
  0x14   :  { %v1009_v20 = vld [vmem:[#allocation2 + $0x20] sm:$0xff]  ;;  %v1024_v22 = vld [vmem:[#allocation2 + $0x98] sm:$0xff]  ;;  %v1030_v23 = vld [vmem:[#allocation2 + $0xc8] sm:$0xff] }
  0x15   :  { %v1017_v21 = vld [vmem:[#allocation2 + $0x60] sm:$0xff]  ;;  %v1010_v24 = vld [vmem:[#allocation2 + $0x28] sm:$0xff]  ;;  %v1031_v27 = vld [vmem:[#allocation2 + $0xd0] sm:$0xff] }
  0x16   :  { %369 = vmatpush.bf16.msra.mxu0 %v1042_v2  ;;  %1051 = vmatpush.bf16.msra.mxu1 %v1042_v2  ;;  %v1018_v25 = vld [vmem:[#allocation2 + $0x68] sm:$0xff]  ;;  %v1025_v26 = vld [vmem:[#allocation2 + $0xa0] sm:$0xff]  ;;  %v1011_v28 = vld [vmem:[#allocation2 + $0x30] sm:$0xff] }
  0x17   :  { %1052 = vmatpush.bf16.msra.mxu2 %v1042_v2  ;;  %1053 = vmatpush.bf16.msra.mxu3 %v1042_v2  ;;  %v1019_v29 = vld [vmem:[#allocation2 + $0x70] sm:$0xff]  ;;  %v1026_v30 = vld [vmem:[#allocation2 + $0xa8] sm:$0xff]  ;;  %v1032_v31 = vld [vmem:[#allocation2 + $0xd8] sm:$0xff] }
  0x18   :  { %v1012_v32 = vld [vmem:[#allocation2 + $0x38] sm:$0xff]  ;;  %v1027_v34 = vld [vmem:[#allocation2 + $0xb0] sm:$0xff]  ;;  %v1033_v35 = vld [vmem:[#allocation2 + $0xe0] sm:$0xff] }
  0x19   :  { %v1020_v33 = vld [vmem:[#allocation2 + $0x78] sm:$0xff]  ;;  %v1034_v39 = vld [vmem:[#allocation2 + $0xe8] sm:$0xff]  ;;  %v1035_v51 = vld [vmem:[#allocation2 + $0xf0] sm:$0xff] }
  0x1a   :  { %370 = vmatpush.bf16.msra.mxu0 %v1041_v3  ;;  %1054 = vmatpush.bf16.msra.mxu1 %v1041_v3  ;;  %v1028_v38 = vld [vmem:[#allocation2 + $0xb8] sm:$0xff] }
  0x1b   :  { %1055 = vmatpush.bf16.msra.mxu2 %v1041_v3  ;;  %1056 = vmatpush.bf16.msra.mxu3 %v1041_v3  ;;  %v1036_v0 = vld [vmem:[#allocation2 + $0xf8] sm:$0xff] }
  0x1e   :  { %371 = vmatpush.bf16.msra.mxu0 %v1040_v4  ;;  %1057 = vmatpush.bf16.msra.mxu1 %v1040_v4 }
  0x1f   :  { %1058 = vmatpush.bf16.msra.mxu2 %v1040_v4  ;;  %1059 = vmatpush.bf16.msra.mxu3 %v1040_v4 }
  0x22   :  { %372 = vmatpush.bf16.msra.mxu0 %v1039_v5  ;;  %1060 = vmatpush.bf16.msra.mxu1 %v1039_v5 }
  0x23   :  { %1061 = vmatpush.bf16.msra.mxu2 %v1039_v5  ;;  %1062 = vmatpush.bf16.msra.mxu3 %v1039_v5 }
  0x26   :  { %373 = vmatpush.bf16.msra.mxu0 %v1038_v6  ;;  %1063 = vmatpush.bf16.msra.mxu1 %v1038_v6 }
  0x27   :  { %1064 = vmatpush.bf16.msra.mxu2 %v1038_v6  ;;  %1065 = vmatpush.bf16.msra.mxu3 %v1038_v6 }
  0x2a   :  { %374 = vmatpush.bf16.msra.mxu0 %v1037_v7  ;;  %1066 = vmatpush.bf16.msra.mxu1 %v1037_v7 }
  0x2b   :  { %1067 = vmatpush.bf16.msra.mxu2 %v1037_v7  ;;  %1068 = vmatpush.bf16.msra.mxu3 %v1037_v7 }
  0x2d   :  { %375 = vmatmul.bf16.vlgmr.msra.gmra.mxu0 %v1005_v8  ;;  %415 = vmatmul.bf16.vlgmr.msra.gmra.mxu1 %v1013_v9 }
  0x2e   :  { %455 = vmatmul.bf16.vlgmr.msra.gmra.mxu2 %v1021_v12  ;;  %495 = vmatmul.bf16.vlgmr.msra.gmra.mxu3 %v1029_v19 }
  0x3d   :  { %380 = vmatmul.bf16.gmra.mxu0 %v1006_v10  ;;  %420 = vmatmul.bf16.gmra.mxu1 %v1014_v11 }
  0x3e   :  { %460 = vmatmul.bf16.gmra.mxu2 %v1022_v15  ;;  %500 = vmatmul.bf16.gmra.mxu3 %v1030_v23 }
  0x4d   :  { %385 = vmatmul.bf16.gmra.mxu0 %v1007_v13  ;;  %425 = vmatmul.bf16.gmra.mxu1 %v1015_v14 }
  0x4e   :  { %465 = vmatmul.bf16.gmra.mxu2 %v1023_v18  ;;  %505 = vmatmul.bf16.gmra.mxu3 %v1031_v27 }
  0x5d   :  { %390 = vmatmul.bf16.gmra.mxu0 %v1008_v16  ;;  %430 = vmatmul.bf16.gmra.mxu1 %v1016_v17 }
  0x5e   :  { %470 = vmatmul.bf16.gmra.mxu2 %v1024_v22  ;;  %510 = vmatmul.bf16.gmra.mxu3 %v1032_v31 }
  0x6d   :  { %395 = vmatmul.bf16.gmra.mxu0 %v1009_v20  ;;  %435 = vmatmul.bf16.gmra.mxu1 %v1017_v21 }
  0x6e   :  { %475 = vmatmul.bf16.gmra.mxu2 %v1025_v26  ;;  %515 = vmatmul.bf16.gmra.mxu3 %v1033_v35 }
  0x7d   :  { %400 = vmatmul.bf16.gmra.mxu0 %v1010_v24  ;;  %440 = vmatmul.bf16.gmra.mxu1 %v1018_v25 }
  0x7e   :  { %480 = vmatmul.bf16.gmra.mxu2 %v1026_v30  ;;  %520 = vmatmul.bf16.gmra.mxu3 %v1034_v39 }
  0x8d   :  { %405 = vmatmul.bf16.gmra.mxu0 %v1011_v28  ;;  %445 = vmatmul.bf16.gmra.mxu1 %v1019_v29 }
  0x8e   :  { %485 = vmatmul.bf16.gmra.mxu2 %v1027_v34  ;;  %525 = vmatmul.bf16.gmra.mxu3 %v1035_v51 }
  0x9d   :  { %410 = vmatmul.bf16.gmra.mxu0 %v1012_v32  ;;  %450 = vmatmul.bf16.gmra.mxu1 %v1020_v33 }
  0x9e   :  { %490 = vmatmul.bf16.gmra.mxu2 %v1028_v38  ;;  %530 = vmatmul.bf16.gmra.mxu3 %v1036_v0 }
  0xaa   :  { %v376_v36 = vpop.f32.mrf.mxu0  ;;  %v1215_v37 = vpop.f32.mrf.mxu1 }
  0xab   :  { %536 = vst [vmem:[#allocation7] sm:$0xff] %v376_v36  ;;  %v669_v42 = vmul.f32 %v376_v36, %v376_v36 }
  0xac   :  { %552 = vst [vmem:[#allocation7 + $0x80] sm:$0xff] %v1215_v37 }
  0xb1   :  { %v1226_v56 = vpop.f32.mrf.mxu2  ;;  %v1256_v10 = vpop.f32.mrf.mxu3 }
  0xb2   :  { %v378_v40 = vpop.f32.mrf.mxu0  ;;  %v1218_v41 = vpop.f32.mrf.mxu1  ;;  %568 = vst [vmem:[#allocation7 + $0x100] sm:$0xff] %v1226_v56 }
  0xb3   :  { %537 = vst [vmem:[#allocation7 + $0x8] sm:$0xff] %v378_v40  ;;  %v600_v43 = vadd.f32 %v378_v40, %v376_v36  ;;  %v670_v44 = vmul.f32 %v378_v40, %v378_v40 }
  0xb4   :  { %553 = vst [vmem:[#allocation7 + $0x88] sm:$0xff] %v1218_v41 }
  0xb5   :  { %v733_v45 = vadd.f32 %v670_v44, %v669_v42  ;;  %584 = vst [vmem:[#allocation7 + $0x180] sm:$0xff] %v1256_v10 }
  0xb9   :  { %v1234_v62 = vpop.f32.mrf.mxu2  ;;  %v1265_v14 = vpop.f32.mrf.mxu3 }
  0xba   :  { %v381_v46 = vpop.f32.mrf.mxu0  ;;  %v1221_v47 = vpop.f32.mrf.mxu1  ;;  %569 = vst [vmem:[#allocation7 + $0x108] sm:$0xff] %v1234_v62 }
  0xbb   :  { %538 = vst [vmem:[#allocation7 + $0x10] sm:$0xff] %v381_v46  ;;  %v601_v48 = vadd.f32 %v600_v43, %v381_v46  ;;  %v671_v49 = vmul.f32 %v381_v46, %v381_v46 }
  0xbc   :  { %554 = vst [vmem:[#allocation7 + $0x90] sm:$0xff] %v1221_v47 }
  0xbd   :  { %v734_v50 = vadd.f32 %v733_v45, %v671_v49  ;;  %585 = vst [vmem:[#allocation7 + $0x188] sm:$0xff] %v1265_v14 }
  0xc1   :  { %v1242_v3 = vpop.f32.mrf.mxu2  ;;  %v1274_v18 = vpop.f32.mrf.mxu3 }
  0xc2   :  { %v383_v52 = vpop.f32.mrf.mxu0  ;;  %v1224_v53 = vpop.f32.mrf.mxu1  ;;  %570 = vst [vmem:[#allocation7 + $0x110] sm:$0xff] %v1242_v3 }
  0xc3   :  { %539 = vst [vmem:[#allocation7 + $0x18] sm:$0xff] %v383_v52  ;;  %v602_v54 = vadd.f32 %v601_v48, %v383_v52  ;;  %v672_v55 = vmul.f32 %v383_v52, %v383_v52 }
  0xc4   :  { %555 = vst [vmem:[#allocation7 + $0x98] sm:$0xff] %v1224_v53 }
  0xc5   :  { %v735_v57 = vadd.f32 %v734_v50, %v672_v55  ;;  %586 = vst [vmem:[#allocation7 + $0x190] sm:$0xff] %v1274_v18 }
  0xc9   :  { %v1248_v6 = vpop.f32.mrf.mxu2  ;;  %v1283_v22 = vpop.f32.mrf.mxu3 }
  0xca   :  { %v386_v58 = vpop.f32.mrf.mxu0  ;;  %v1230_v59 = vpop.f32.mrf.mxu1  ;;  %571 = vst [vmem:[#allocation7 + $0x118] sm:$0xff] %v1248_v6 }
  0xcb   :  { %540 = vst [vmem:[#allocation7 + $0x20] sm:$0xff] %v386_v58  ;;  %v1232_v60 = vadd.f32 %v602_v54, %v386_v58  ;;  %v673_v61 = vmul.f32 %v386_v58, %v386_v58 }
  0xcc   :  { %556 = vst [vmem:[#allocation7 + $0xa0] sm:$0xff] %v1230_v59 }
  0xcd   :  { %v1237_v63 = vadd.f32 %v735_v57, %v673_v61  ;;  %587 = vst [vmem:[#allocation7 + $0x198] sm:$0xff] %v1283_v22 }
  0xd1   :  { %v1254_v9 = vpop.f32.mrf.mxu2  ;;  %v1292_v26 = vpop.f32.mrf.mxu3 }
  0xd2   :  { %v388_v1 = vpop.f32.mrf.mxu0  ;;  %v1240_v2 = vpop.f32.mrf.mxu1  ;;  %572 = vst [vmem:[#allocation7 + $0x120] sm:$0xff] %v1254_v9 }
  0xd3   :  { %541 = vst [vmem:[#allocation7 + $0x28] sm:$0xff] %v388_v1  ;;  %v674_v31 = vmul.f32 %v388_v1, %v388_v1  ;;  %v604_v32 = vadd.f32 %v1232_v60, %v388_v1 }
  0xd4   :  { %557 = vst [vmem:[#allocation7 + $0xa8] sm:$0xff] %v1240_v2 }
  0xd5   :  { %588 = vst [vmem:[#allocation7 + $0x1a0] sm:$0xff] %v1292_v26  ;;  %v737_v34 = vadd.f32 %v1237_v63, %v674_v31 }
  0xd9   :  { %v1263_v13 = vpop.f32.mrf.mxu2  ;;  %v1301_v30 = vpop.f32.mrf.mxu3 }
  0xda   :  { %v391_v4 = vpop.f32.mrf.mxu0  ;;  %v1246_v5 = vpop.f32.mrf.mxu1  ;;  %573 = vst [vmem:[#allocation7 + $0x128] sm:$0xff] %v1263_v13 }
  0xdb   :  { %542 = vst [vmem:[#allocation7 + $0x30] sm:$0xff] %v391_v4  ;;  %v675_v33 = vmul.f32 %v391_v4, %v391_v4  ;;  %v605_v35 = vadd.f32 %v604_v32, %v391_v4 }
  0xdc   :  { %558 = vst [vmem:[#allocation7 + $0xb0] sm:$0xff] %v1246_v5 }
  0xdd   :  { %589 = vst [vmem:[#allocation7 + $0x1a8] sm:$0xff] %v1301_v30  ;;  %v738_v40 = vadd.f32 %v737_v34, %v675_v33 }
  0xe1   :  { %v1272_v17 = vpop.f32.mrf.mxu2  ;;  %v1312_v45 = vpop.f32.mrf.mxu3 }
  0xe2   :  { %v393_v7 = vpop.f32.mrf.mxu0  ;;  %v1252_v8 = vpop.f32.mrf.mxu1  ;;  %574 = vst [vmem:[#allocation7 + $0x130] sm:$0xff] %v1272_v17 }
  0xe3   :  { %543 = vst [vmem:[#allocation7 + $0x38] sm:$0xff] %v393_v7  ;;  %v676_v36 = vmul.f32 %v393_v7, %v393_v7  ;;  %v606_v42 = vadd.f32 %v605_v35, %v393_v7 }
  0xe4   :  { %559 = vst [vmem:[#allocation7 + $0xb8] sm:$0xff] %v1252_v8 }
  0xe5   :  { %v739_v46 = vadd.f32 %v738_v40, %v676_v36  ;;  %590 = vst [vmem:[#allocation7 + $0x1b0] sm:$0xff] %v1312_v45 }
  0xe9   :  { %v1281_v21 = vpop.f32.mrf.mxu2  ;;  %v1321_v4 = vpop.f32.mrf.mxu3 }
  0xea   :  { %v396_v11 = vpop.f32.mrf.mxu0  ;;  %v1261_v12 = vpop.f32.mrf.mxu1  ;;  %575 = vst [vmem:[#allocation7 + $0x138] sm:$0xff] %v1281_v21 }
  0xeb   :  { %544 = vst [vmem:[#allocation7 + $0x40] sm:$0xff] %v396_v11  ;;  %v677_v43 = vmul.f32 %v396_v11, %v396_v11  ;;  %v607_v48 = vadd.f32 %v606_v42, %v396_v11 }
  0xec   :  { %560 = vst [vmem:[#allocation7 + $0xc0] sm:$0xff] %v1261_v12 }
  0xed   :  { %v740_v50 = vadd.f32 %v739_v46, %v677_v43  ;;  %591 = vst [vmem:[#allocation7 + $0x1b8] sm:$0xff] %v1321_v4  ;;  %v685_v46 = vmul.f32 %v1215_v37, %v1215_v37 }
  0xf1   :  { %v1290_v25 = vpop.f32.mrf.mxu2 }
  0xf2   :  { %v398_v15 = vpop.f32.mrf.mxu0  ;;  %v1270_v16 = vpop.f32.mrf.mxu1  ;;  %576 = vst [vmem:[#allocation7 + $0x140] sm:$0xff] %v1290_v25 }
  0xf3   :  { %545 = vst [vmem:[#allocation7 + $0x48] sm:$0xff] %v398_v15  ;;  %v678_v49 = vmul.f32 %v398_v15, %v398_v15  ;;  %v608_v51 = vadd.f32 %v607_v48, %v398_v15 }
  0xf4   :  { %561 = vst [vmem:[#allocation7 + $0xc8] sm:$0xff] %v1270_v16 }
  0xf5   :  { %v741_v54 = vadd.f32 %v740_v50, %v678_v49  ;;  %v686_v49 = vmul.f32 %v1218_v41, %v1218_v41 }
  0xf9   :  { %v1299_v29 = vpop.f32.mrf.mxu2 }
  0xfa   :  { %v401_v19 = vpop.f32.mrf.mxu0  ;;  %v1279_v20 = vpop.f32.mrf.mxu1  ;;  %577 = vst [vmem:[#allocation7 + $0x148] sm:$0xff] %v1299_v29 }
  0xfb   :  { %546 = vst [vmem:[#allocation7 + $0x50] sm:$0xff] %v401_v19  ;;  %v679_v52 = vmul.f32 %v401_v19, %v401_v19  ;;  %v609_v55 = vadd.f32 %v608_v51, %v401_v19 }
  0xfc   :  { %562 = vst [vmem:[#allocation7 + $0xd0] sm:$0xff] %v1279_v20 }
  0xfd   :  { %v742_v61 = vadd.f32 %v741_v54, %v679_v52  ;;  %v687_v52 = vmul.f32 %v1221_v47, %v1221_v47 }
 0x101   :  { %v1310_v44 = vpop.f32.mrf.mxu2 }
 0x102   :  { %v403_v23 = vpop.f32.mrf.mxu0  ;;  %v1288_v24 = vpop.f32.mrf.mxu1  ;;  %578 = vst [vmem:[#allocation7 + $0x150] sm:$0xff] %v1310_v44 }
 0x103   :  { %547 = vst [vmem:[#allocation7 + $0x58] sm:$0xff] %v403_v23  ;;  %v680_v57 = vmul.f32 %v403_v23, %v403_v23  ;;  %v610_v63 = vadd.f32 %v609_v55, %v403_v23 }
 0x104   :  { %563 = vst [vmem:[#allocation7 + $0xd8] sm:$0xff] %v1288_v24 }
 0x105   :  { %v743_v7 = vadd.f32 %v742_v61, %v680_v57 }
 0x109   :  { %v1319_v1 = vpop.f32.mrf.mxu2 }
 0x10a   :  { %v406_v27 = vpop.f32.mrf.mxu0  ;;  %v1297_v28 = vpop.f32.mrf.mxu1  ;;  %579 = vst [vmem:[#allocation7 + $0x158] sm:$0xff] %v1319_v1 }
 0x10b   :  { %548 = vst [vmem:[#allocation7 + $0x60] sm:$0xff] %v406_v27  ;;  %v681_v0 = vmul.f32 %v406_v27, %v406_v27  ;;  %v611_v11 = vadd.f32 %v610_v63, %v406_v27  ;;  %v1330_v27 = vpop.f32.mrf.mxu3 }
 0x10c   :  { %564 = vst [vmem:[#allocation7 + $0xe0] sm:$0xff] %v1297_v28 }
 0x10d   :  { %v744_v19 = vadd.f32 %v743_v7, %v681_v0  ;;  %592 = vst [vmem:[#allocation7 + $0x1c0] sm:$0xff] %v1330_v27 }
 0x111   :  { %v1328_v43 = vpop.f32.mrf.mxu2 }
 0x112   :  { %v408_v38 = vpop.f32.mrf.mxu0  ;;  %v1308_v39 = vpop.f32.mrf.mxu1  ;;  %580 = vst [vmem:[#allocation7 + $0x160] sm:$0xff] %v1328_v43 }
 0x113   :  { %549 = vst [vmem:[#allocation7 + $0x68] sm:$0xff] %v408_v38  ;;  %v682_v15 = vmul.f32 %v408_v38, %v408_v38  ;;  %v612_v31 = vadd.f32 %v611_v11, %v408_v38  ;;  %v1349_v63 = vpop.f32.mrf.mxu3 }
 0x114   :  { %565 = vst [vmem:[#allocation7 + $0xe8] sm:$0xff] %v1308_v39 }
 0x115   :  { %v745_v33 = vadd.f32 %v744_v19, %v682_v15  ;;  %593 = vst [vmem:[#allocation7 + $0x1c8] sm:$0xff] %v1349_v63  ;;  %v691_v15 = vmul.f32 %v1246_v5, %v1246_v5 }
 0x119   :  { %v1347_v61 = vpop.f32.mrf.mxu2 }
 0x11a   :  { %v411_v58 = vpop.f32.mrf.mxu0  ;;  %v1317_v60 = vpop.f32.mrf.mxu1  ;;  %581 = vst [vmem:[#allocation7 + $0x168] sm:$0xff] %v1347_v61 }
 0x11b   :  { %550 = vst [vmem:[#allocation7 + $0x70] sm:$0xff] %v411_v58  ;;  %v683_v32 = vmul.f32 %v411_v58, %v411_v58  ;;  %v613_v23 = vadd.f32 %v612_v31, %v411_v58 }
 0x11c   :  { %566 = vst [vmem:[#allocation7 + $0xf0] sm:$0xff] %v1317_v60 }
 0x11d   :  { %v746_v36 = vadd.f32 %v745_v33, %v683_v32  ;;  %v692_v32 = vmul.f32 %v1252_v8, %v1252_v8 }
 0x122   :  { %v413_v34 = vpop.f32.mrf.mxu0  ;;  %v1326_v35 = vpop.f32.mrf.mxu1 }
 0x123   :  { %551 = vst [vmem:[#allocation7 + $0x78] sm:$0xff] %v413_v34  ;;  %v614_v40 = vadd.f32 %v613_v23, %v413_v34  ;;  %v684_v42 = vmul.f32 %v413_v34, %v413_v34  ;;  %v1365_v23 = vpop.f32.mrf.mxu2  ;;  %v1367_v34 = vpop.f32.mrf.mxu3 }
 0x124   :  { %567 = vst [vmem:[#allocation7 + $0xf8] sm:$0xff] %v1326_v35 }
 0x125   :  { %v615_v38 = vadd.f32 %v614_v40, %v1215_v37  ;;  %v747_v48 = vadd.f32 %v746_v36, %v684_v42  ;;  %v688_v37 = vmul.f32 %v1224_v53, %v1224_v53  ;;  %582 = vst [vmem:[#allocation7 + $0x170] sm:$0xff] %v1365_v23 }
 0x126   :  { %594 = vst [vmem:[#allocation7 + $0x1d0] sm:$0xff] %v1367_v34 }
 0x127   :  { %v616_v50 = vadd.f32 %v615_v38, %v1218_v41  ;;  %v748_v51 = vadd.f32 %v747_v48, %v685_v46  ;;  %v689_v41 = vmul.f32 %v1230_v59, %v1230_v59  ;;  %v695_v46 = vmul.f32 %v1279_v20, %v1279_v20 }
 0x129   :  { %v617_v54 = vadd.f32 %v616_v50, %v1221_v47  ;;  %v749_v55 = vadd.f32 %v748_v51, %v686_v49  ;;  %v690_v47 = vmul.f32 %v1240_v2, %v1240_v2  ;;  %v696_v49 = vmul.f32 %v1288_v24, %v1288_v24 }
 0x12b   :  { %v618_v57 = vadd.f32 %v617_v54, %v1224_v53  ;;  %v750_v58 = vadd.f32 %v749_v55, %v687_v52  ;;  %v1383_v51 = vpop.f32.mrf.mxu2  ;;  %v1385_v52 = vpop.f32.mrf.mxu3  ;;  %v697_v54 = vmul.f32 %v1297_v28, %v1297_v28 }
 0x12c   :  { %583 = vst [vmem:[#allocation7 + $0x178] sm:$0xff] %v1383_v51 }
 0x12d   :  { %v619_v0 = vadd.f32 %v618_v57, %v1230_v59  ;;  %v751_v7 = vadd.f32 %v750_v58, %v688_v37  ;;  %595 = vst [vmem:[#allocation7 + $0x1d8] sm:$0xff] %v1385_v52 }
 0x12f   :  { %v620_v53 = vadd.f32 %v619_v0, %v1240_v2  ;;  %v752_v11 = vadd.f32 %v751_v7, %v689_v41  ;;  %v693_v2 = vmul.f32 %v1261_v12, %v1261_v12  ;;  %v699_v41 = vmul.f32 %v1317_v60, %v1317_v60 }
 0x131   :  { %v753_v19 = vadd.f32 %v752_v11, %v690_v47  ;;  %v621_v31 = vadd.f32 %v620_v53, %v1246_v5  ;;  %v694_v5 = vmul.f32 %v1270_v16, %v1270_v16  ;;  %v701_v53 = vmul.f32 %v1226_v56, %v1226_v56 }
 0x133   :  { %v622_v59 = vadd.f32 %v621_v31, %v1252_v8  ;;  %v754_v33 = vadd.f32 %v753_v19, %v691_v15  ;;  %v1401_v47 = vpop.f32.mrf.mxu3  ;;  %v702_v15 = vmul.f32 %v1234_v62, %v1234_v62  ;;  %v703_v31 = vmul.f32 %v1242_v3, %v1242_v3 }
 0x134   :  { %596 = vst [vmem:[#allocation7 + $0x1e0] sm:$0xff] %v1401_v47 }
 0x135   :  { %v623_v36 = vadd.f32 %v622_v59, %v1261_v12  ;;  %v755_v40 = vadd.f32 %v754_v33, %v692_v32  ;;  %v704_v59 = vmul.f32 %v1248_v6, %v1248_v6 }
 0x137   :  { %v624_v8 = vadd.f32 %v623_v36, %v1270_v16  ;;  %v756_v42 = vadd.f32 %v755_v40, %v693_v2 }
 0x139   :  { %v625_v38 = vadd.f32 %v624_v8, %v1279_v20  ;;  %v757_v48 = vadd.f32 %v756_v42, %v694_v5 }
 0x13b   :  { %v626_v12 = vadd.f32 %v625_v38, %v1288_v24  ;;  %v758_v50 = vadd.f32 %v757_v48, %v695_v46  ;;  %v698_v24 = vmul.f32 %v1308_v39, %v1308_v39  ;;  %v708_v38 = vmul.f32 %v1281_v21, %v1281_v21 }
 0x13d   :  { %v627_v16 = vadd.f32 %v626_v12, %v1297_v28  ;;  %v759_v55 = vadd.f32 %v758_v50, %v696_v49  ;;  %v700_v28 = vmul.f32 %v1326_v35, %v1326_v35 }
 0x13f   :  { %v760_v20 = vadd.f32 %v759_v55, %v697_v54  ;;  %v628_v37 = vadd.f32 %v627_v16, %v1308_v39  ;;  %v711_v54 = vmul.f32 %v1310_v44, %v1310_v44 }
 0x141   :  { %v761_v57 = vadd.f32 %v760_v20, %v698_v24  ;;  %v629_v58 = vadd.f32 %v628_v37, %v1317_v60  ;;  %v712_v37 = vmul.f32 %v1319_v1, %v1319_v1 }
 0x143   :  { %v762_v0 = vadd.f32 %v761_v57, %v699_v41  ;;  %v630_v7 = vadd.f32 %v629_v58, %v1326_v35  ;;  %v713_v41 = vmul.f32 %v1328_v43, %v1328_v43 }
 0x145   :  { %v631_v39 = vadd.f32 %v630_v7, %v1226_v56  ;;  %v763_v11 = vadd.f32 %v762_v0, %v700_v28  ;;  %v1416_v56 = vpop.f32.mrf.mxu3 }
 0x146   :  { %597 = vst [vmem:[#allocation7 + $0x1e8] sm:$0xff] %v1416_v56 }
 0x147   :  { %v632_v60 = vadd.f32 %v631_v39, %v1234_v62  ;;  %v764_v19 = vadd.f32 %v763_v11, %v701_v53  ;;  %v705_v62 = vmul.f32 %v1254_v9, %v1254_v9  ;;  %v715_v53 = vmul.f32 %v1365_v23, %v1365_v23 }
 0x149   :  { %v633_v35 = vadd.f32 %v632_v60, %v1242_v3  ;;  %v765_v32 = vadd.f32 %v764_v19, %v702_v15  ;;  %v706_v3 = vmul.f32 %v1263_v13, %v1263_v13  ;;  %v717_v15 = vmul.f32 %v1256_v10, %v1256_v10 }
 0x14b   :  { %v634_v33 = vadd.f32 %v633_v35, %v1248_v6  ;;  %v766_v2 = vadd.f32 %v765_v32, %v703_v31  ;;  %v707_v6 = vmul.f32 %v1272_v17, %v1272_v17 }
 0x14d   :  { %v635_v36 = vadd.f32 %v634_v33, %v1254_v9  ;;  %v767_v40 = vadd.f32 %v766_v2, %v704_v59  ;;  %v1431_v9 = vpop.f32.mrf.mxu3 }
 0x14e   :  { %598 = vst [vmem:[#allocation7 + $0x1f0] sm:$0xff] %v1431_v9 }
 0x14f   :  { %v636_v5 = vadd.f32 %v635_v36, %v1263_v13  ;;  %v768_v8 = vadd.f32 %v767_v40, %v705_v62  ;;  %v709_v13 = vmul.f32 %v1290_v25, %v1290_v25 }
 0x151   :  { %v769_v42 = vadd.f32 %v768_v8, %v706_v3  ;;  %v637_v46 = vadd.f32 %v636_v5, %v1272_v17  ;;  %v710_v17 = vmul.f32 %v1299_v29, %v1299_v29 }
 0x153   :  { %v638_v48 = vadd.f32 %v637_v46, %v1281_v21  ;;  %v770_v49 = vadd.f32 %v769_v42, %v707_v6 }
 0x155   :  { %v639_v12 = vadd.f32 %v638_v48, %v1290_v25  ;;  %v771_v50 = vadd.f32 %v770_v49, %v708_v38  ;;  %v1449_v57 = vpop.f32.mrf.mxu3 }
 0x156   :  { %599 = vst [vmem:[#allocation7 + $0x1f8] sm:$0xff] %v1449_v57 }
 0x157   :  { %v640_v21 = vadd.f32 %v639_v12, %v1299_v29  ;;  %v772_v16 = vadd.f32 %v771_v50, %v709_v13  ;;  %821 = dma.vmem_to_hbm [thread:$0]  %s814_s1, 8192, %s816_s26, [#allocation4], %s1186_s2, %s1186_s2, %s1187_s27   ;;  %v728_v50 = vmul.f32 %v1385_v52, %v1385_v52 }
 0x159   :  { %v641_v55 = vadd.f32 %v640_v21, %v1310_v44  ;;  %v773_v20 = vadd.f32 %v772_v16, %v710_v17  ;;  %v729_v16 = vmul.f32 %v1401_v47, %v1401_v47 }
 0x15b   :  { %v642_v25 = vadd.f32 %v641_v55, %v1319_v1  ;;  %v774_v24 = vadd.f32 %v773_v20, %v711_v54  ;;  %v714_v1 = vmul.f32 %v1347_v61, %v1347_v61  ;;  %v730_v55 = vmul.f32 %v1416_v56, %v1416_v56 }
 0x15d   :  { %v775_v29 = vadd.f32 %v774_v24, %v712_v37  ;;  %v643_v58 = vadd.f32 %v642_v25, %v1328_v43  ;;  %v716_v43 = vmul.f32 %v1383_v51, %v1383_v51  ;;  %v731_v25 = vmul.f32 %v1431_v9, %v1431_v9 }
 0x15e   :  { %v732_v24 = vmul.f32 %v1449_v57, %v1449_v57 }
 0x15f   :  { %v776_v44 = vadd.f32 %v775_v29, %v713_v41  ;;  %v644_v0 = vadd.f32 %v643_v58, %v1347_v61  ;;  %v718_v61 = vmul.f32 %v1265_v14, %v1265_v14 }
 0x161   :  { %v777_v7 = vadd.f32 %v776_v44, %v714_v1  ;;  %v645_v28 = vadd.f32 %v644_v0, %v1365_v23  ;;  %v719_v23 = vmul.f32 %v1274_v18, %v1274_v18  ;;  %v802_v44 = vlaneseq }
 0x163   :  { %v778_v39 = vadd.f32 %v777_v7, %v715_v53  ;;  %v646_v11 = vadd.f32 %v645_v28, %v1383_v51  ;;  %v720_v51 = vmul.f32 %v1283_v22, %v1283_v22  ;;  %v803_v28 = vshrl.u32 %v802_v44, 7 }
 0x165   :  { %v647_v60 = vadd.f32 %v646_v11, %v1256_v10  ;;  %v779_v19 = vadd.f32 %v778_v39, %v716_v43  ;;  %v721_v10 = vmul.f32 %v1292_v26, %v1292_v26  ;;  %vm805_vm0 = vcmp.eq.s32.totalorder %v803_v28, 1 }
 0x166   :  { %vm804_vm1 = vcmp.eq.s32.totalorder %v803_v28, 0 }
 0x167   :  { %v648_v31 = vadd.f32 %v647_v60, %v1265_v14  ;;  %v780_v35 = vadd.f32 %v779_v19, %v717_v15  ;;  %v722_v14 = vmul.f32 %v1301_v30, %v1301_v30 }
 0x169   :  { %v649_v32 = vadd.f32 %v648_v31, %v1274_v18  ;;  %v781_v59 = vadd.f32 %v780_v35, %v718_v61  ;;  %v723_v18 = vmul.f32 %v1312_v45, %v1312_v45 }
 0x16b   :  { %v650_v33 = vadd.f32 %v649_v32, %v1283_v22  ;;  %v782_v2 = vadd.f32 %v781_v59, %v719_v23  ;;  %v724_v22 = vmul.f32 %v1321_v4, %v1321_v4 }
 0x16d   :  { %v651_v62 = vadd.f32 %v650_v33, %v1292_v26  ;;  %v783_v36 = vadd.f32 %v782_v2, %v720_v51  ;;  %v725_v26 = vmul.f32 %v1330_v27, %v1330_v27 }
 0x16f   :  { %v652_v40 = vadd.f32 %v651_v62, %v1301_v30  ;;  %v784_v3 = vadd.f32 %v783_v36, %v721_v10  ;;  %v726_v30 = vmul.f32 %v1349_v63, %v1349_v63 }
 0x171   :  { %v785_v5 = vadd.f32 %v784_v3, %v722_v14  ;;  %v653_v8 = vadd.f32 %v652_v40, %v1312_v45  ;;  %v727_v45 = vmul.f32 %v1367_v34, %v1367_v34 }
 0x173   :  { %v654_v6 = vadd.f32 %v653_v8, %v1321_v4  ;;  %v786_v42 = vadd.f32 %v785_v5, %v723_v18 }
 0x175   :  { %v655_v46 = vadd.f32 %v654_v6, %v1330_v27  ;;  %v787_v38 = vadd.f32 %v786_v42, %v724_v22 }
 0x177   :  { %v656_v48 = vadd.f32 %v655_v46, %v1349_v63  ;;  %v788_v49 = vadd.f32 %v787_v38, %v725_v26 }
 0x179   :  { %v657_v13 = vadd.f32 %v656_v48, %v1367_v34  ;;  %v789_v12 = vadd.f32 %v788_v49, %v726_v30 }
 0x17b   :  { %v658_v4 = vadd.f32 %v657_v13, %v1385_v52  ;;  %v790_v17 = vadd.f32 %v789_v12, %v727_v45 }
 0x17d   :  { %v791_v27 = vadd.f32 %v790_v17, %v728_v50  ;;  %v659_v21 = vadd.f32 %v658_v4, %v1401_v47 }
 0x17f   :  { %v792_v63 = vadd.f32 %v791_v27, %v729_v16  ;;  %v660_v54 = vadd.f32 %v659_v21, %v1416_v56 }
 0x181   :  { %v793_v34 = vadd.f32 %v792_v63, %v730_v55  ;;  %v661_v20 = vadd.f32 %v660_v54, %v1431_v9 }
 0x183   :  { %v794_v52 = vadd.f32 %v793_v34, %v731_v25  ;;  %v662_v37 = vadd.f32 %v661_v20, %v1449_v57 }
 0x185   :  { %v663_v29 = vrot.slane %v662_v37, 4  ;;  %v795_v47 = vadd.f32 %v794_v52, %v732_v24 }
 0x187   :  { %v664_v58 = vadd.f32 %v663_v29, %v662_v37  ;;  %v796_v41 = vrot.slane %v795_v47, 4 }
 0x189   :  { %v665_v0 = vrot.slane %v664_v58, 2  ;;  %v797_v1 = vadd.f32 %v796_v41, %v795_v47 }
 0x18b   :  { %v666_v56 = vadd.f32 %v665_v0, %v664_v58  ;;  %v798_v7 = vrot.slane %v797_v1, 2 }
 0x18d   :  { %v799_v53 = vadd.f32 %v798_v7, %v797_v1  ;;  %v667_v39 = vrot.slane %v666_v56, 1 }
 0x18f   :  { %v800_v11 = vrot.slane %v799_v53, 1  ;;  %v668_v57 = vadd.f32 %v667_v39, %v666_v56 }
 0x191   :  { %v801_v9 = vadd.f32 %v800_v11, %v799_v53 }
 0x193   :  { %v806_v43 = vsel %vm805_vm0, %v801_v9, 0.0 }
 0x194   :  { %v807_v15 = vsel %vm804_vm1, %v668_v57, %v806_v43 }
 0x195   :  { %808 = vst [vmem:[#allocation8] sm:$0xff] %v807_v15 }
 0x196   :  { %832 = dma.vmem_to_hbm [thread:$0]  %s828_s29, 128, %s830_s5, [#allocation9]  }
 0x197   :  { %1177 = dma.done.wait [#allocation4], 8192  }
 0x198   :  { %1178 = vsyncadd [#allocation4], 4294959104 }
 0x199   :  { %1179 = dma.done.wait [#allocation9], 128  }
 0x19a   :  { %1180 = vsyncadd [#allocation9], 4294967168 }
 0x19b   :  { %841 = vsyncpa [#allocation3], 1 }
 0x19c   :  { %842 = vsyncpa [#allocation6], 1 }
 0x19d   :  { %843 = vsyncpa [#allocation4], 1 }
 0x19e   :  { %844 = vsyncpa [#allocation9], 1 }

</bundles_post_ra>
